<compile_context>
chip_gen: v7x
topology: tpu7x:2x2x1
jax: 0.10.0
libtpu: 0.0.40
codegen_flags: <defaults>
</compile_context>

<pallas_src>
import jax
import jax.numpy as jnp
from jax import lax
from jax.experimental import pallas as pl
from jax.experimental.pallas import tpu as pltpu

_LANE = 128
_MIN_VMEM_LIMIT = 32 << 20      # above v5e's 16 MiB scoped default


def _vmem_capacity_bytes():
    """Physical VMEM per TensorCore (128 MiB v5e/v6e, 64 MiB v7x); conservative
    fallback if the query is unavailable."""
    try:
        cap = int(pltpu.get_tpu_info().vmem_capacity_bytes)
        if cap > 0:
            return cap
    except Exception:
        pass
    return 64 << 20


def _clamp_vmem(est, cap):
    hi = max(cap - (8 << 20), _MIN_VMEM_LIMIT)
    return int(min(max(int(est), _MIN_VMEM_LIMIT), hi))


def _excite(y, w1_ref, w2_ref):
    """(Bt, C) f32 pooled features -> (Bt, C) f32 sigmoid gate.

    Always on the MXU (idle in this HBM-bound kernel), even for tiny mid."""
    h = jnp.dot(y, w1_ref[...], preferred_element_type=jnp.float32)
    h = jnp.maximum(h, 0.0)
    z = jnp.dot(h, w2_ref[...], preferred_element_type=jnp.float32)
    return jax.nn.sigmoid(z)


# ---------------------------------------------------------------------------
# Fused single-pass kernel: pooling + excitation + rescale on a batch tile.
# ---------------------------------------------------------------------------
def _fused_kernel(x_ref, dct_ref, w1_ref, w2_ref, o_ref):
    # x_ref/o_ref: (Bt, C, HW)   channels on sublanes, spatial on lanes
    # dct_ref:     (C, HW)       grid-invariant
    # w1_ref:      (C, mid) f32; w2_ref: (mid, C) f32
    x = x_ref[...]                                                     # native dtype
    y = jnp.sum(x * dct_ref[...][None], axis=-1, dtype=jnp.float32)    # (Bt, C)
    z = _excite(y, w1_ref, w2_ref)                                     # (Bt, C) f32
    # TODO(synk): for bf16 inputs the gate is applied in bf16 (reference uses f32);
    # exact for f32 inputs.
    o_ref[...] = x * z[:, :, None].astype(x.dtype)


def _fused_call(x2, dct2, w1p, w2p, *, bt, vmem_limit, cost):
    B, C, HW = x2.shape
    steps = -(-B // bt)
    blk = (bt, C, HW)
    return pl.pallas_call(
        _fused_kernel,
        out_shape=jax.ShapeDtypeStruct((B, C, HW), x2.dtype),
        grid_spec=pltpu.PrefetchScalarGridSpec(
            num_scalar_prefetch=0,
            grid=(steps,),
            in_specs=[
                pl.BlockSpec(blk, lambda b: (b, 0, 0)),
                pl.BlockSpec(dct2.shape, lambda b: (0, 0)),
                pl.BlockSpec(w1p.shape, lambda b: (0, 0)),
                pl.BlockSpec(w2p.shape, lambda b: (0, 0)),
            ],
            out_specs=pl.BlockSpec(blk, lambda b: (b, 0, 0)),
        ),
        compiler_params=pltpu.CompilerParams(
            dimension_semantics=("parallel",),
            vmem_limit_bytes=vmem_limit),
        cost_estimate=cost,
    )(x2, dct2, w1p, w2p)


# ---------------------------------------------------------------------------
# Two-pass path for single images larger than the block budget:
#   pass 1: pool over spatial chunks (accumulator) + excitation at the last chunk
#   pass 2: rescale x by the per-channel gate
# ---------------------------------------------------------------------------
def _make_pool_excite_kernel(hw, thw):
    needs_mask = (hw % thw) != 0

    def kernel(x_ref, dct_ref, w1_ref, w2_ref, z_ref):
        s = pl.program_id(1)

        @pl.when(s == 0)
        def _():
            z_ref[...] = jnp.zeros_like(z_ref)

        prod = x_ref[...] * dct_ref[...][None]                       # (1, C, thw)
        if needs_mask:
            lane = lax.broadcasted_iota(jnp.int32, prod.shape, prod.ndim - 1)
            prod = jnp.where(s * thw + lane < hw, prod, jnp.zeros_like(prod))
        z_ref[...] += jnp.sum(prod, axis=-1, dtype=jnp.float32)[:, None, :]

        @pl.when(s == pl.num_programs(1) - 1)
        def _():
            y = z_ref[...][:, 0, :]                                  # (1, C) f32
            z_ref[...] = _excite(y, w1_ref, w2_ref)[:, None, :]

    return kernel


def _rescale_kernel(x_ref, z_ref, o_ref):
    x = x_ref[...]                                                   # (1, C, thw)
    z = z_ref[...][:, 0, :]                                          # (1, C) f32
    o_ref[...] = x * z[:, :, None].astype(x.dtype)


def _two_pass_call(x2, dct2, w1p, w2p, *, thw, cap):
    B, C, HW = x2.shape
    mid = w1p.shape[1]
    ns = -(-HW // thw)
    xb = x2.dtype.itemsize
    db = dct2.dtype.itemsize

    pool_est = (2 * C * thw * xb + 2 * C * thw * db + C * thw * 4
                + 8 * (w1p.size + w2p.size) + (2 << 20))
    z = pl.pallas_call(
        _make_pool_excite_kernel(HW, thw),
        out_shape=jax.ShapeDtypeStruct((B, 1, C), jnp.float32),
        grid_spec=pltpu.PrefetchScalarGridSpec(
            num_scalar_prefetch=0,
            grid=(B, ns),
            in_specs=[
                pl.BlockSpec((1, C, thw), lambda b, s: (b, 0, s)),
                pl.BlockSpec((C, thw), lambda b, s: (0, s)),
                pl.BlockSpec(w1p.shape, lambda b, s: (0, 0)),
                pl.BlockSpec(w2p.shape, lambda b, s: (0, 0)),
            ],
            out_specs=pl.BlockSpec((1, 1, C), lambda b, s: (b, 0, 0)),
        ),
        compiler_params=pltpu.CompilerParams(
            dimension_semantics=("parallel", "arbitrary"),
            vmem_limit_bytes=_clamp_vmem(pool_est, cap)),
        cost_estimate=pl.CostEstimate(
            flops=int(2 * B * C * HW + 4 * B * C * mid),
            transcendentals=int(B * C),
            bytes_accessed=int(B * C * HW * xb + C * HW * db + B * C * 4)),
    )(x2, dct2, w1p, w2p)

    rescale_est = 4 * C * thw * xb + C * thw * 4 + (2 << 20)
    return pl.pallas_call(
        _rescale_kernel,
        out_shape=jax.ShapeDtypeStruct((B, C, HW), x2.dtype),
        grid_spec=pltpu.PrefetchScalarGridSpec(
            num_scalar_prefetch=0,
            grid=(B, ns),
            in_specs=[
                pl.BlockSpec((1, C, thw), lambda b, s: (b, 0, s)),
                pl.BlockSpec((1, 1, C), lambda b, s: (b, 0, 0)),
            ],
            out_specs=pl.BlockSpec((1, C, thw), lambda b, s: (b, 0, s)),
        ),
        compiler_params=pltpu.CompilerParams(
            dimension_semantics=("parallel", "parallel"),
            vmem_limit_bytes=_clamp_vmem(rescale_est, cap)),
        cost_estimate=pl.CostEstimate(
            flops=int(B * C * HW),
            transcendentals=0,
            bytes_accessed=int(2 * B * C * HW * xb + B * C * 4)),
    )(x2, z)


# ---------------------------------------------------------------------------
# Wrapper
# ---------------------------------------------------------------------------
def fca_block(x, dct_weight, w1, w2, *, max_block_bytes=None):
    """FcaNet frequency channel attention.

    x:          (B, C, H, W)
    dct_weight: (C, H, W)
    w1:         (mid, C)   PyTorch Linear(C, mid, bias=False).weight
    w2:         (C, mid)   PyTorch Linear(mid, C, bias=False).weight
    max_block_bytes: optional override of the per-block byte budget (testing).
    """
    B, C, H, W = x.shape
    mid = w1.shape[0]
    assert w1.shape == (mid, C) and w2.shape == (C, mid)
    hw = H * W

    x2 = x.reshape(B, C, hw)
    dct2 = dct_weight.reshape(C, hw)
    # Pre-transposed, f32 weights: both matmuls are plain row-major, no in-kernel
    # transposes; the weights are tiny so the upcast is negligible.
    w1p = w1.T.astype(jnp.float32)        # (C, mid)
    w2p = w2.T.astype(jnp.float32)        # (mid, C)

    itemsize = x2.dtype.itemsize
    cap = _vmem_capacity_bytes()
    usable = max(min(int(cap * 0.72), cap - (8 << 20)), 24 << 20)
    block_cap = cap // 8                  # ~16 MiB on v5e/v6e, ~8 MiB on v7x
    if max_block_bytes is not None:
        block_cap = min(block_cap, int(max_block_bytes))

    per_image = C * hw * itemsize
    const_bytes = dct2.size * dct2.dtype.itemsize + 4 * (w1p.size + w2p.size)
    # Per-batch-row VMEM cost: double-buffered x + out blocks plus a block-sized
    # f32 temporary (the x*dct product / reduce temp), scaled with the block.
    per_row = 4 * per_image + C * hw * 4
    fixed = 2 * const_bytes + (2 << 20)

    fits_fused = (per_row + fixed <= usable) and (per_image <= block_cap)

    if fits_fused:
        bt_budget = max((usable - fixed) // per_row, 1)
        bt = max(1, min(B, block_cap // per_image, bt_budget))
        steps = -(-B // bt)
        if steps == 1 and B >= 2:
            bt = (B + 1) // 2             # keep >=2 grid steps (megacore / pipeline)
        elif 2 <= steps < 16 and steps % 2 == 1:
            bt = -(-B // (steps + 1))     # even step count for v7x's 2 TensorCores
        est = bt * per_row + fixed
        cost = pl.CostEstimate(
            flops=int(3 * B * C * hw + 4 * B * C * mid),
            transcendentals=int(B * C),
            bytes_accessed=int(2 * B * C * hw * itemsize
                               + C * hw * dct2.dtype.itemsize
                               + 4 * (w1p.size + w2p.size)))
        out = _fused_call(x2, dct2, w1p, w2p, bt=bt,
                          vmem_limit=_clamp_vmem(est, cap), cost=cost)
    else:
        # Single image bigger than the block budget: split the spatial axis.
        thw = max(_LANE, (block_cap // max(C * itemsize, 1)) // _LANE * _LANE)
        thw = min(thw, -(-hw // _LANE) * _LANE)
        out = _two_pass_call(x2, dct2, w1p, w2p, thw=thw, cap=cap)

    return out.reshape(B, C, H, W)


def fca_reference(x, dct_weight, w1, w2):
    y = jnp.sum(x * dct_weight[None], axis=(2, 3))           # (B, C)
    h = jnp.maximum(y @ w1.T, 0.0)                           # (B, mid)
    z = jax.nn.sigmoid(h @ w2.T)                             # (B, C)
    return x * z[:, :, None, None]


if __name__ == "__main__":
    def run_case(key, B, C, H, W, reduction, **kwargs):
        mid = max(C // reduction, 1)
        kx, kd, k1, k2 = jax.random.split(key, 4)
        x = jax.random.normal(kx, (B, C, H, W), dtype=jnp.float32)
        dct_weight = jax.random.normal(kd, (C, H, W), dtype=jnp.float32) * 0.1
        # PyTorch-native Linear weights (out_features, in_features), bias=False.
        w1 = jax.random.normal(k1, (mid, C), dtype=jnp.float32) * (1.0 / (C ** 0.5))
        w2 = jax.random.normal(k2, (C, mid), dtype=jnp.float32) * (1.0 / (mid ** 0.5))

        out = jax.block_until_ready(fca_block(x, dct_weight, w1, w2, **kwargs))
        ref = fca_reference(x, dct_weight, w1, w2)
        assert out.shape == (B, C, H, W)
        assert jnp.allclose(out, ref, rtol=1e-4, atol=1e-4), "mismatch vs reference"

    key = jax.random.PRNGKey(0)
    k_a, k_b, k_c = jax.random.split(key, 3)
    # Fused path: mid=2 (tiny MXU matmul), two even grid steps.
    run_case(k_a, B=4, C=32, H=16, W=16, reduction=16)
    # Fused path: H*W=64 (< 128 -> masked tail stores, no padding pass) and a
    # ragged batch tail (B=3 -> bt=2 -> last block half out of bounds, discarded).
    run_case(k_b, B=3, C=128, H=8, W=8, reduction=4)
    # Two-pass (pool/rescale) path, forced via a tiny block budget; the 30x30
    # feature map also exercises the ragged spatial tail mask in the accumulator.
    run_case(k_c, B=2, C=32, H=30, W=30, reduction=8, max_block_bytes=64 << 10)

    print("KERNEL_OK")
</pallas_src>

<mosaic_0001>
module attributes {stable_mosaic.version = 11 : i64} {
  func.func @_fused_kernel(%arg0: i32, %arg1: memref<2x32x256xf32, #tpu.memory_space<vmem>>, %arg2: memref<32x256xf32, #tpu.memory_space<vmem>>, %arg3: memref<32x2xf32, #tpu.memory_space<vmem>>, %arg4: memref<2x32xf32, #tpu.memory_space<vmem>>, %arg5: memref<2x32x256xf32, #tpu.memory_space<vmem>>) attributes {dimension_semantics = [#tpu.dimension_semantics<parallel>], iteration_bounds = array<i64: 2>, scalar_prefetch = 0 : i64, scratch_operands = 0 : i64, tpu.core_type = #tpu.core_type<tc>, window_params = [{transform_indices = @transform_0, window_bounds = array<i64: 2, 32, 256>}, {pipeline_mode = #tpu.pipeline_mode<synchronous>, transform_indices = @transform_1, window_bounds = array<i64: 32, 256>}, {pipeline_mode = #tpu.pipeline_mode<synchronous>, transform_indices = @transform_2, window_bounds = array<i64: 32, 2>}, {pipeline_mode = #tpu.pipeline_mode<synchronous>, transform_indices = @transform_3, window_bounds = array<i64: 2, 32>}, {transform_indices = @transform_4, window_bounds = array<i64: 2, 32, 256>}]} {
    %c0 = arith.constant 0 : index
    %c0_0 = arith.constant 0 : index
    %c0_1 = arith.constant 0 : index
    %0 = vector.load %arg1[%c0, %c0_0, %c0_1] : memref<2x32x256xf32, #tpu.memory_space<vmem>>, vector<2x32x256xf32>
    %c0_2 = arith.constant 0 : index
    %c0_3 = arith.constant 0 : index
    %1 = vector.load %arg2[%c0_2, %c0_3] : memref<32x256xf32, #tpu.memory_space<vmem>>, vector<32x256xf32>
    %2 = vector.shape_cast %1 : vector<32x256xf32> to vector<1x32x256xf32>
    %3 = vector.broadcast %2 : vector<1x32x256xf32> to vector<2x32x256xf32>
    %4 = arith.mulf %0, %3 : vector<2x32x256xf32>
    %cst = arith.constant dense<0.000000e+00> : vector<2x32xf32>
    %5 = vector.multi_reduction <add>, %4, %cst [2] : vector<2x32x256xf32> to vector<2x32xf32>
    %c0_4 = arith.constant 0 : index
    %c0_5 = arith.constant 0 : index
    %6 = vector.load %arg3[%c0_4, %c0_5] : memref<32x2xf32, #tpu.memory_space<vmem>>, vector<32x2xf32>
    %cst_6 = arith.constant dense<0.000000e+00> : vector<2x2xf32>
    %7 = tpu.matmul %5, %6, %cst_6 {dimension_numbers = #tpu.dot_dimension_numbers<[1], [0], [0], [1], [0, 0, 1, 1], [], []>} : vector<2x32xf32>, vector<32x2xf32>, vector<2x2xf32> -> vector<2x2xf32>
    %cst_7 = arith.constant 0.000000e+00 : f32
    %8 = vector.broadcast %cst_7 : f32 to vector<2x2xf32>
    %9 = arith.maximumf %7, %8 : vector<2x2xf32>
    %c0_8 = arith.constant 0 : index
    %c0_9 = arith.constant 0 : index
    %10 = vector.load %arg4[%c0_8, %c0_9] : memref<2x32xf32, #tpu.memory_space<vmem>>, vector<2x32xf32>
    %cst_10 = arith.constant dense<0.000000e+00> : vector<2x32xf32>
    %11 = tpu.matmul %9, %10, %cst_10 {dimension_numbers = #tpu.dot_dimension_numbers<[1], [0], [0], [1], [0, 0, 1, 1], [], []>} : vector<2x2xf32>, vector<2x32xf32>, vector<2x32xf32> -> vector<2x32xf32>
    %12 = arith.negf %11 : vector<2x32xf32>
    %13 = math.exp %12 : vector<2x32xf32>
    %cst_11 = arith.constant 1.000000e+00 : f32
    %14 = vector.broadcast %cst_11 : f32 to vector<2x32xf32>
    %15 = arith.addf %14, %13 : vector<2x32xf32>
    %16 = arith.divf %14, %15 : vector<2x32xf32>
    %17 = vector.shape_cast %16 : vector<2x32xf32> to vector<2x32x1xf32>
    %18 = vector.broadcast %17 : vector<2x32x1xf32> to vector<2x32x256xf32>
    %19 = arith.mulf %0, %18 : vector<2x32x256xf32>
    %c0_12 = arith.constant 0 : index
    %c0_13 = arith.constant 0 : index
    %c0_14 = arith.constant 0 : index
    %20 = vector.load %arg5[%c0_12, %c0_13, %c0_14] : memref<2x32x256xf32, #tpu.memory_space<vmem>>, vector<2x32x256xf32>
    tpu.vector_store %arg5[%c0_12, %c0_13, %c0_14], %19 {strides = array<i32>} : memref<2x32x256xf32, #tpu.memory_space<vmem>>, vector<2x32x256xf32>,
    return
  }
  func.func @transform_0(%arg0: i32) -> (i32, i32, i32) {
    %c0_i32 = arith.constant 0 : i32
    %c0_i32_0 = arith.constant 0 : i32
    %c0_i32_1 = arith.constant 0 : i32
    return %arg0, %c0_i32, %c0_i32_0 : i32, i32, i32
  }
  func.func @transform_1(%arg0: i32) -> (i32, i32) {
    %c0_i32 = arith.constant 0 : i32
    %c0_i32_0 = arith.constant 0 : i32
    %c0_i32_1 = arith.constant 0 : i32
    return %c0_i32, %c0_i32_0 : i32, i32
  }
  func.func @transform_2(%arg0: i32) -> (i32, i32) {
    %c0_i32 = arith.constant 0 : i32
    %c0_i32_0 = arith.constant 0 : i32
    %c0_i32_1 = arith.constant 0 : i32
    return %c0_i32, %c0_i32_0 : i32, i32
  }
  func.func @transform_3(%arg0: i32) -> (i32, i32) {
    %c0_i32 = arith.constant 0 : i32
    %c0_i32_0 = arith.constant 0 : i32
    %c0_i32_1 = arith.constant 0 : i32
    return %c0_i32, %c0_i32_0 : i32, i32
  }
  func.func @transform_4(%arg0: i32) -> (i32, i32, i32) {
    %c0_i32 = arith.constant 0 : i32
    %c0_i32_0 = arith.constant 0 : i32
    %c0_i32_1 = arith.constant 0 : i32
    return %arg0, %c0_i32, %c0_i32_0 : i32, i32, i32
  }
}

</mosaic_0001>

<bundles_post_ra>
// kernel: tpu_custom_call.1
= control target key start
LH: loop header
LB: loop body
LE: loop exit
PB: predicated region body
PF: predicated region fallthrough
CT: control target
= control target key end

     0   :  { %9 = vsyncpa [#allocation3], 0  ;;  %s1300_s0 = inlined_call_operand.hbm [shape: f32[4,32,256], index: 0, kind: input, shape index: {}]   ;;  %s1301_s1 = inlined_call_operand.hbm [shape: f32[32,256], index: 1, kind: input, shape index: {}]   ;;  %s1302_s2 = inlined_call_operand.vmem [shape: f32[32,2], index: 2, kind: input, shape index: {}]   ;;  %s1303_s3 = inlined_call_operand.vmem [shape: f32[2,32], index: 3, kind: input, shape index: {}]   ;;  %s1304_s4 = inlined_call_operand.hbm [shape: f32[4,32,256], index: 4, kind: output, shape index: {}]  }
   0x1   :  { %11 = vsyncpa [#allocation3 + $0x1], 0 }
   0x2   :  { %12 = vsyncpa [#allocation6], 0 }
   0x3   :  { %13 = vsyncpa [#allocation4], 0 }
   0x4   :  { %15 = vsyncpa [#allocation4 + $0x1], 0  ;;  %s973_s15 = smov 0   ;;  %s975_s16 = smov 0  }
   0x5   :  { %s977_s17 = smov 0   ;;  %s979_s18 = smov 0  }
   0x6 LB: > { %s994_s19 = sadd.s32 4294967295, %s936_s18   ;;  %s685_s20 = sadd.s32 4294967294, %s936_s18   ;;  %s936_s18 = sphi %s979_s18, %s1324_s18   ;;  %s932_s17 = sphi %s977_s17, %s1323_s17   ;;  %s928_s16 = sphi %s975_s16, %s1322_s16   ;;  %s924_s15 = sphi %s973_s15, %s1321_s15  }
   0x7   : > { %p41_p0 = scmp.ne.s32.totalorder %s928_s16, %s924_s15  ;;  %p1305_p1 = scmp.eq.s32.totalorder %s994_s19, 0 }
   0x8   : > { %p134_p3 = scmp.eq.s32.totalorder %s685_s20, 1  ;;  %p686_p5 = scmp.ge.s32.totalorder %s936_s18, 1 }
   0x9   : > { %p1003_p4 = por %p1305_p1, %p41_p0  ;;  %p141_p7 = scmp.lt.s32.totalorder %s936_s18, 3 }
   0xa   : > { %p1008_p6 = por %p134_p3, %p41_p0  ;;  %s938_s24 = smov [#allocation5]  }
   0xb   : > { %s1308_s21 = scalar_select %p1003_p4, 1, 0 }
   0xc   : > { %s1309_s22 = scalar_select %p1008_p6, 1, 0 }
   0xd   : > { %p1013_p8 = pnand %p686_p5, %p141_p7  ;;  %s153_s25 = sshll.u32 %s938_s24, 4  ;;  %s1017_s25 = int_to_ptr.vmem [resolvable:$true] %s153_s25 }
   0xe   : > { %s1029_s27 = sadd.s32 1, %s936_s18   ;;  %s28_s28 = sadd.s32 1, %s932_s17 }
   0xf   : > { %s1310_s23 = scalar_select %p1013_p8, 1, 0 }
  0x10   : > { %p748_p9 = pneg %p1013_p8  ;;  %s25_s29 = ssub.s32 %s936_s18, %s1029_s27 }
  0x11   : > { %s808_s6 = scalar_lea.hbm %s1301_s1, 1024 }
  0x12   : > { %p1024_p11 = pnand %p748_p9, %p1305_p1  ;;  %p809_p12 = scmp.ne.s32.totalorder %s1301_s1, %s808_s6 }
  0x13   : > { %p815_p5 = scmp.lt.u32.totalorder %s808_s6, %s1301_s1 }
  0x14   : > { %p810_p13 = pneg %p1024_p11 }
  0x16   : > { %p811_p0 = pnand %p810_p13, %p809_p12 }
  0x18   : > { %p812_p3 = pneg %p811_p0 }
  0x1a   : > { %p817_p7 = pnand %p815_p5, %p812_p3 }
  0x1c   : > { %820 = shalt.err (!%p817_p7)
}
  0x1d   : > { %s821_s11 = scalar_lea.vmem %s1017_s25, 1024  ;;  %p829_p2 = scmp.lt.s32.totalorder %s1017_s25, %s1017_s25 }
  0x1e   : > { %p822_p9 = scmp.ne.s32.totalorder %s1017_s25, %s821_s11  ;;  %p830_p6 = scmp.lt.s32.totalorder %s821_s11, %s821_s11 }
  0x20   : > { %p824_p10 = pnand %p822_p9, %p810_p13  ;;  %p831_p4 = por %p830_p6, %p829_p2 }
  0x22   : > { %p825_p1 = pneg %p824_p10 }
  0x24   : > { %p832_p8 = pnand %p831_p4, %p825_p1 }
  0x26   : > { %835 = shalt.err (!%p832_p8)
}
  0x27   : > { %s939_s12 = smov 256   ;;  %s940_s13 = smov 16  }
  0x28   : > { %751 = dma.hbm_to_vmem [thread:$0]  (!%p1024_p11), %s1301_s1, 1024, %s1017_s25, [#allocation6], %s939_s12, %s939_s12, %s940_s13  }
  0x29   : > { %p26_p1 = scmp.eq.s32.totalorder %s25_s29, 0  ;;  %p35_p2 = scmp.ne.s32.totalorder %s932_s17, %s928_s16 }
  0x2a   : > { %p36_p4 = scmp.eq.s32.totalorder %s936_s18, 0  ;;  %p761_p6 = scmp.lt.s32.totalorder %s936_s18, 2 }
  0x2b   : > { %s1063_s24 = scalar_select %p26_p1, %s932_s17, %s28_s28  }
  0x2c   : > { %p37_p8 = por %p36_p4, %p35_p2  ;;  %p1312_p10 = scmp.eq.s32.totalorder %s994_s19, 1 }
  0x2d   : > { %s173_s26 = sand.u32 1, %s932_s17   ;;  %s708_s5 = sshll.u32 %s936_s18, 11 }
  0x2e   : > { %p1067_p12 = por %p1312_p10, %p35_p2  ;;  %s689_s6 = sshll.u32 %s173_s26, 7 }
  0x2f   : > { %s1076_s9 = scalar_lea.hbm %s1300_s0, %s708_s5  ;;  %s177_s25 = scalar_lea.vmem [#allocation2], %s689_s6 }
  0x30   : > { %s185_s28 = sshll.u32 %s177_s25, 4  ;;  %p1078_p11 = pnand %p761_p6, %p37_p8  ;;  %s1082_s28 = int_to_ptr.vmem [resolvable:$true] %s185_s28 }
  0x31   : > { %s1084_s10 = scalar_lea.sflag [#allocation3], %s173_s26  ;;  %s836_s11 = scalar_lea.hbm %s1076_s9, 2048 }
  0x32   : > { %p837_p13 = scmp.ne.s32.totalorder %s1076_s9, %s836_s11  ;;  %p838_p0 = pneg %p1078_p11 }
  0x33   : > { %s841_s5 = scalar_lea.hbm %s1300_s0, 4096  ;;  %p842_p7 = scmp.lt.u32.totalorder %s1076_s9, %s1300_s0 }
  0x34   : > { %p839_p3 = pnand %p838_p0, %p837_p13  ;;  %p843_p9 = scmp.lt.u32.totalorder %s841_s5, %s836_s11 }
  0x35   : > { %p845_p2 = scmp.lt.u32.totalorder %s836_s11, %s1076_s9 }
  0x36   : > { %p840_p5 = pneg %p839_p3  ;;  %p844_p1 = por %p843_p9, %p842_p7 }
  0x38   : > { %p846_p4 = por %p845_p2, %p844_p1 }
  0x3a   : > { %p847_p6 = pnand %p846_p4, %p840_p5 }
  0x3c   : > { %850 = shalt.err (!%p847_p6)
}
  0x3d   : > { %s851_s26 = scalar_lea.vmem %s1082_s28, 2048  ;;  %s941_s8 = smov [#allocation2]  }
  0x3e   : > { %p852_p8 = scmp.ne.s32.totalorder %s1082_s28, %s851_s26  ;;  %s856_s25 = sshll.u32 %s941_s8, 4  ;;  %s857_s25 = int_to_ptr.vmem [resolvable:$false] %s856_s25 }
  0x3f   : > { %s858_s14 = scalar_lea.vmem %s857_s25, 4096  ;;  %p859_p3 = scmp.lt.s32.totalorder %s1082_s28, %s857_s25 }
  0x40   : > { %p854_p10 = pnand %p852_p8, %p838_p0  ;;  %p860_p7 = scmp.lt.s32.totalorder %s858_s14, %s851_s26 }
  0x42   : > { %p855_p13 = pneg %p854_p10  ;;  %p861_p9 = por %p860_p7, %p859_p3 }
  0x44   : > { %p862_p1 = pnand %p861_p9, %p855_p13 }
  0x46   : > { %865 = shalt.err (!%p862_p1)
}
  0x47   : > { %755 = dma.hbm_to_vmem [thread:$0]  (!%p1078_p11), %s1076_s9, 2048, %s1082_s28, %s1084_s10, %s939_s12, %s939_s12, %s940_s13  }
  0x48   : > { %p1315_p0 = scmp.ne.s32.totalorder %s1310_s23, 0 }
  0x49   : > { %s1118_s11 = sand.u32 (!%p1315_p0), 1, %s928_s16   ;;  %p1316_p5 = scmp.ne.s32.totalorder (!%p1315_p0), %s1308_s21, 0 }
  0x4a   : > { %197 = sbr.rel (%p1315_p0) target bundleno = 852 (0x354), region = 36  ;;  %s694_s20 = sshll.u32 (!%p1315_p0), %s1118_s11, 7 }
  0x4b   : > { %s200_s5 = scalar_lea.sflag (!%p1315_p0), [#allocation3], %s1118_s11  ;;  %s1124_s29 = scalar_lea.vmem (!%p1315_p0), [#allocation2], %s694_s20 }
  0x51   : > { %911 = dma.done.wait (%p1316_p5), %s200_s5, 2048  }
  0x52   : > { %913 = vsyncadd (%p1316_p5), %s200_s5, 4294965248  ;;  %p1317_p11 = scmp.eq.s32.totalorder %s994_s19, 0 }
  0x54   : > { %915 = dma.done.wait (%p1317_p11), [#allocation6], 1024   ;;  %p1318_p2 = pmov %p1317_p11 }
  0x55   : > { %v1135_v0 = vld [vmem:[%s1124_s29 + $0x40] sm:$0xff]  ;;  %v1138_v1 = vld [vmem:[%s1124_s29 + $0x48] sm:$0xff]  ;;  %v1151_v10 = vld [vmem:[%s1124_s29 + $0x50] sm:$0xff]  ;;  %v942_v51 = vmov 0.0|0.0   ;;  %vm943_vm0 = vmmov 0   ;;  %v944_v55 = vmov 0.0   ;;  %v310_v56 = vlaneseq }
  0x56   : > { %917 = vsyncadd (%p1318_p2), [#allocation6], 4294966272  ;;  %v250_v2 = vld [vmem:[#allocation5] sm:$0xff]  ;;  %v251_v3 = vld [vmem:[#allocation5 + $0x8] sm:$0xff]  ;;  %734 = vmatprep.subr.bf16.mxu0 %v942_v51  ;;  %726 = vmatprep.mubr.msk.f32.mxu0 %vm943_vm0, %v944_v55  ;;  %vm321_vm1 = vcmask 130112   ;;  %vm328_vm2 = vcmask 195712  }
  0x57   : > { %v266_v4 = vmul.f32 %v250_v2, %v1135_v0  ;;  %v1142_v5 = vld [vmem:[%s1124_s29] sm:$0xff]  ;;  %v1145_v6 = vld [vmem:[%s1124_s29 + $0x8] sm:$0xff]  ;;  %v267_v7 = vmul.f32 %v251_v3, %v1138_v1  ;;  %v1154_v11 = vld [vmem:[%s1124_s29 + $0x58] sm:$0xff]  ;;  %729 = vmatprep.subr.mxu1 %v944_v55  ;;  %731 = vmatprep.mubr.msk.f32.mxu1 %vm943_vm0, %v944_v55  ;;  %v311_v57 = vand.u32 127, %v310_v56  ;;  %v313_v62 = vshrl.u32 %v310_v56, 7  ;;  %s1219_s8 = scalar_lea.vmem [#allocation7], %s694_s20 }
  0x58   : > { %v258_v8 = vmul.f32 %v250_v2, %v1142_v5  ;;  %v259_v9 = vmul.f32 %v251_v3, %v1145_v6  ;;  %v252_v12 = vld [vmem:[#allocation5 + $0x10] sm:$0xff]  ;;  %v253_v13 = vld [vmem:[#allocation5 + $0x18] sm:$0xff]  ;;  %v1166_v21 = vld [vmem:[%s1124_s29 + $0x60] sm:$0xff]  ;;  %vm335_vm3 = vcmask 261312   ;;  %vm356_vm4 = vcmask 1041409   ;;  %s710_s25 = sshll.u32 %s994_s19, 11 }
  0x59   : > { %v268_v14 = vmul.f32 %v252_v12, %v1151_v10  ;;  %v1158_v15 = vld [vmem:[%s1124_s29 + $0x10] sm:$0xff]  ;;  %v1161_v16 = vld [vmem:[%s1124_s29 + $0x18] sm:$0xff]  ;;  %v286_v17 = vadd.f32 %v267_v7, %v266_v4  ;;  %v269_v19 = vmul.f32 %v253_v13, %v1154_v11  ;;  %v1169_v22 = vld [vmem:[%s1124_s29 + $0x68] sm:$0xff]  ;;  %v316_v60 = vadd.s32 4294967288, %v311_v57  ;;  %s602_s14 = sshll.u32 %s1219_s8, 4  ;;  %s588_s19 = scalar_lea.sflag [#allocation4], %s1118_s11  ;;  %s1252_s14 = int_to_ptr.vmem [resolvable:$true] %s602_s14 }
  0x5a   : > { %v274_v18 = vadd.f32 %v259_v9, %v258_v8  ;;  %v260_v20 = vmul.f32 %v252_v12, %v1158_v15  ;;  %v254_v23 = vld [vmem:[#allocation5 + $0x20] sm:$0xff]  ;;  %v261_v24 = vmul.f32 %v253_v13, %v1161_v16  ;;  %v255_v25 = vld [vmem:[#allocation5 + $0x28] sm:$0xff]  ;;  %v1182_v32 = vld [vmem:[%s1124_s29 + $0x70] sm:$0xff]  ;;  %v323_v61 = vadd.s32 4294967280, %v311_v57  ;;  %s866_s21 = scalar_lea.vmem %s1252_s14, 2048  ;;  %s945_s23 = smov [#allocation7]  }
  0x5b   : > { %v270_v26 = vmul.f32 %v254_v23, %v1166_v21  ;;  %v1174_v27 = vld [vmem:[%s1124_s29 + $0x20] sm:$0xff]  ;;  %v1177_v28 = vld [vmem:[%s1124_s29 + $0x28] sm:$0xff]  ;;  %287 = vadd.xlane.f32.xlu1 %v286_v17  ;;  %v289_v29 = vadd.f32 %v269_v19, %v268_v14  ;;  %v271_v30 = vmul.f32 %v255_v25, %v1169_v22  ;;  %v1185_v33 = vld [vmem:[%s1124_s29 + $0x78] sm:$0xff]  ;;  %v319_v3 = vsub.s32 %v316_v60, %v313_v62  ;;  %p867_p4 = scmp.ne.s32.totalorder %s1252_s14, %s866_s21  ;;  %s870_s12 = sshll.u32 %s945_s23, 4  ;;  %s871_s12 = int_to_ptr.vmem [resolvable:$false] %s870_s12 }
  0x5c   : > { %275 = vadd.xlane.f32.xlu0 %v274_v18  ;;  %v262_v31 = vmul.f32 %v254_v23, %v1174_v27  ;;  %v256_v34 = vld [vmem:[#allocation5 + $0x30] sm:$0xff]  ;;  %v277_v35 = vadd.f32 %v261_v24, %v260_v20  ;;  %v263_v36 = vmul.f32 %v255_v25, %v1177_v28  ;;  %v257_v37 = vld [vmem:[#allocation5 + $0x38] sm:$0xff]  ;;  %v298_v48 = vld [vmem:[%s1302_s2] sm:$0xff]  ;;  %v330_v4 = vadd.s32 4294967272, %v311_v57  ;;  %s872_s13 = scalar_lea.vmem %s871_s12, 4096  ;;  %p873_p10 = scmp.lt.s32.totalorder %s1252_s14, %s871_s12 }
  0x5d   : > { %v1189_v38 = vld [vmem:[%s1124_s29 + $0x30] sm:$0xff]  ;;  %v1192_v39 = vld [vmem:[%s1124_s29 + $0x38] sm:$0xff]  ;;  %v292_v40 = vadd.f32 %v271_v30, %v270_v26  ;;  %v272_v41 = vmul.f32 %v256_v34, %v1182_v32  ;;  %v273_v42 = vmul.f32 %v257_v37, %v1185_v33  ;;  %v299_v49 = vld [vmem:[%s1302_s2 + $0x8] sm:$0xff]  ;;  %v326_v7 = vsub.s32 %v323_v61, %v313_v62  ;;  %s1250_s29 = scalar_lea.hbm %s1304_s4, %s710_s25  ;;  %p868_p6 = pnand %p867_p4, %p1067_p12 }
  0x5e   : > { %v280_v43 = vadd.f32 %v263_v36, %v262_v31  ;;  %v264_v44 = vmul.f32 %v256_v34, %v1189_v38  ;;  %v265_v45 = vmul.f32 %v257_v37, %v1192_v39  ;;  %v735_v50 = vpack.c.bf16 %v299_v49, %v298_v48  ;;  %v300_v52 = vld [vmem:[%s1302_s2 + $0x10] sm:$0xff]  ;;  %v301_v53 = vld [vmem:[%s1302_s2 + $0x18] sm:$0xff]  ;;  %p874_p13 = scmp.lt.s32.totalorder %s872_s13, %s866_s21 }
  0x5f   : > { %290 = vadd.xlane.f32.xlu1 %v289_v29  ;;  %v295_v46 = vadd.f32 %v273_v42, %v272_v41  ;;  %v738_v54 = vpack.c.bf16 %v301_v53, %v300_v52  ;;  %v314_v8 = vsub.s32 %v311_v57, %v313_v62  ;;  %v333_v17 = vsub.s32 %v330_v4, %v313_v62  ;;  %v432_v41 = vld [vmem:[%s1303_s3] sm:$0x3]  ;;  %p869_p8 = pneg %p868_p6 }
  0x60   : > { %278 = vadd.xlane.f32.xlu0 %v277_v35  ;;  %v283_v47 = vadd.f32 %v265_v45, %v264_v44  ;;  %736 = vmatpush3.bf16.msra.mxu0 %v735_v50  ;;  %vm358_vm5 = vcmask 261120   ;;  %vm437_vm6 = vcmask 1041408   ;;  %vm433_vm7 = vcmask 15360   ;;  %p875_p3 = por %p874_p13, %p873_p10 }
  0x61   : > { %737 = vmatprep.subr.bf16.mxu0 %v942_v51  ;;  %730 = vmatpush3.msk.msra.mxu1 %vm437_vm6, %v432_v41  ;;  %v519_v50 = vsub.s32 0, %v313_v62  ;;  %v538_v53 = vsub.s32 1, %v313_v62 }
  0x62   : > { %p876_p7 = pnand %p875_p3, %p869_p8 }
  0x63   : > { %293 = vadd.xlane.f32.xlu1 %v292_v40 }
  0x64   : > { %281 = vadd.xlane.f32.xlu0 %v280_v43  ;;  %739 = vmatpush3.bf16.msra.mxu0 %v738_v54 }
  0x67   : > { %296 = vadd.xlane.f32.xlu1 %v295_v46 }
  0x68   : > { %284 = vadd.xlane.f32.xlu0 %v283_v47 }
  0xe8   : > { %v288_v58 = vpop.xlane.xlu1 %287 }
  0xe9   : > { %v276_v59 = vpop.xlane.xlu0 %275  ;;  %v340_v20 = vrot.slane %v288_v58, %v314_v8 }
  0xea   : > { %v315_v23 = vrot.slane %v276_v59, %v314_v8 }
  0xec   : > { %v291_v63 = vpop.xlane.xlu1 %290 }
  0xed   : > { %v279_v2 = vpop.xlane.xlu0 %278  ;;  %v344_v13 = vrot.slane %v291_v63, %v319_v3 }
  0xee   : > { %v320_v14 = vrot.slane %v279_v2, %v319_v3 }
  0xef   : > { %v345_v26 = vsel %vm321_vm1, %v344_v13, %v340_v20 }
  0xf0   : > { %v294_v9 = vpop.xlane.xlu1 %293  ;;  %v322_v29 = vsel %vm321_vm1, %v320_v14, %v315_v23 }
  0xf1   : > { %v282_v12 = vpop.xlane.xlu0 %281  ;;  %v349_v18 = vrot.slane %v294_v9, %v326_v7 }
  0xf2   : > { %v327_v19 = vrot.slane %v282_v12, %v326_v7 }
  0xf3   : > { %v350_v34 = vsel %vm328_vm2, %v349_v18, %v345_v26 }
  0xf4   : > { %v297_v24 = vpop.xlane.xlu1 %296  ;;  %v329_v35 = vsel %vm328_vm2, %v327_v19, %v322_v29 }
  0xf5   : > { %v285_v25 = vpop.xlane.xlu0 %284  ;;  %v354_v30 = vrot.slane %v297_v24, %v333_v17 }
  0xf6   : > { %v334_v31 = vrot.slane %v285_v25, %v333_v17 }
  0xf7   : > { %v355_v36 = vsel %vm335_vm3, %v354_v30, %v350_v34 }
  0xf8   : > { %v336_v37 = vsel %vm335_vm3, %v334_v31, %v329_v35 }
  0xf9   : > { %v357_v40 = vsel %vm356_vm4, %v355_v36, %v336_v37 }
  0xfa   : > { %727 = vmatmul.mubr.msk.f32.vlgmr.msra.gmra.mrb[0].mxu0 %vm358_vm5, %v357_v40 }
 0x1cd   : > { %v427_v42 = vpop.f32.mrb[0].mxu0 }
 0x1ce   : > { %v431_v43 = vmax.f32 %v427_v42, 0.0  ;;  %v728_v44 = vpop.f32.mrb[1].mxu0 }
 0x1d0   : > { %732 = vmatmul.mubr.msk.f32.vlgmr.msra.gmra.mrb[0].mxu1 %vm433_vm7, %v431_v43 }
 0x2a3   : > { %v507_v45 = vpop.f32.mrb[0].mxu1 }
 0x2a4   : > { %v700_v46 = vmul.f32 -1.442695, %v507_v45  ;;  %v733_v47 = vpop.f32.mrb[1].mxu1 }
 0x2a6   : > { %804 = vpow2.f32 %v700_v46 }
 0x2b0   : > { %v805_v48 = vpop.eup %804 }
 0x2b1   : > { %v514_v49 = vadd.f32 1.0, %v805_v48 }
 0x2b3   : > { %806 = vrcp.f32 %v514_v49 }
 0x2bd   : > { %v807_v51 = vpop.eup %806 }
 0x2be   : > { %v520_v52 = vrot.slane %v807_v51, %v519_v50  ;;  %v539_v54 = vrot.slane %v807_v51, %v538_v53 }
 0x2c0   : > { %526 = vbcast.lane.b32.xlu1 %v520_v52, 264  ;;  %522 = vbcast.lane.b32.xlu0 %v520_v52, 256 }
 0x2c4   : > { %530 = vbcast.lane.b32.xlu1 %v520_v52, 272  ;;  %541 = vbcast.lane.b32.xlu0 %v539_v54, 256 }
 0x2c8   : > { %534 = vbcast.lane.b32.xlu1 %v520_v52, 280  ;;  %549 = vbcast.lane.b32.xlu0 %v539_v54, 272 }
 0x2cc   : > { %545 = vbcast.lane.b32.xlu1 %v539_v54, 264 }
 0x2d0   : > { %553 = vbcast.lane.b32.xlu1 %v539_v54, 280 }
 0x332   : > { %v527_v55 = vpop.permute.xlu1 %526  ;;  %v523_v56 = vpop.permute.xlu0 %522 }
 0x333   : > { %v557_v57 = vmul.f32 %v527_v55, %v1158_v15  ;;  %v558_v58 = vmul.f32 %v527_v55, %v1161_v16  ;;  %v555_v59 = vmul.f32 %v523_v56, %v1142_v5  ;;  %v556_v60 = vmul.f32 %v523_v56, %v1145_v6 }
 0x335   : > { %573 = vst [vmem:[%s1219_s8 + $0x10] sm:$0xff] %v557_v57  ;;  %574 = vst [vmem:[%s1219_s8 + $0x18] sm:$0xff] %v558_v58 }
 0x336   : > { %571 = vst [vmem:[%s1219_s8] sm:$0xff] %v555_v59  ;;  %572 = vst [vmem:[%s1219_s8 + $0x8] sm:$0xff] %v556_v60  ;;  %v531_v15 = vpop.permute.xlu1 %530  ;;  %v542_v5 = vpop.permute.xlu0 %541 }
 0x337   : > { %v559_v6 = vmul.f32 %v531_v15, %v1174_v27  ;;  %v560_v16 = vmul.f32 %v531_v15, %v1177_v28  ;;  %v563_v61 = vmul.f32 %v542_v5, %v1135_v0  ;;  %v564_v62 = vmul.f32 %v542_v5, %v1138_v1 }
 0x339   : > { %575 = vst [vmem:[%s1219_s8 + $0x20] sm:$0xff] %v559_v6  ;;  %576 = vst [vmem:[%s1219_s8 + $0x28] sm:$0xff] %v560_v16 }
 0x33a   : > { %579 = vst [vmem:[%s1219_s8 + $0x40] sm:$0xff] %v563_v61  ;;  %580 = vst [vmem:[%s1219_s8 + $0x48] sm:$0xff] %v564_v62  ;;  %v535_v63 = vpop.permute.xlu1 %534  ;;  %v550_v2 = vpop.permute.xlu0 %549 }
 0x33b   : > { %v561_v27 = vmul.f32 %v535_v63, %v1189_v38  ;;  %v562_v3 = vmul.f32 %v535_v63, %v1192_v39  ;;  %v567_v28 = vmul.f32 %v550_v2, %v1166_v21  ;;  %v568_v0 = vmul.f32 %v550_v2, %v1169_v22 }
 0x33d   : > { %577 = vst [vmem:[%s1219_s8 + $0x30] sm:$0xff] %v561_v27  ;;  %578 = vst [vmem:[%s1219_s8 + $0x38] sm:$0xff] %v562_v3 }
 0x33e   : > { %583 = vst [vmem:[%s1219_s8 + $0x60] sm:$0xff] %v567_v28  ;;  %584 = vst [vmem:[%s1219_s8 + $0x68] sm:$0xff] %v568_v0  ;;  %v546_v1 = vpop.permute.xlu1 %545 }
 0x33f   : > { %v565_v4 = vmul.f32 %v546_v1, %v1151_v10  ;;  %v566_v7 = vmul.f32 %v546_v1, %v1154_v11 }
 0x341   : > { %581 = vst [vmem:[%s1219_s8 + $0x50] sm:$0xff] %v565_v4  ;;  %582 = vst [vmem:[%s1219_s8 + $0x58] sm:$0xff] %v566_v7 }
 0x342   : > { %v554_v21 = vpop.permute.xlu1 %553 }
 0x343   : > { %v569_v10 = vmul.f32 %v554_v21, %v1182_v32  ;;  %v570_v22 = vmul.f32 %v554_v21, %v1185_v33 }
 0x345   : > { %585 = vst [vmem:[%s1219_s8 + $0x70] sm:$0xff] %v569_v10  ;;  %586 = vst [vmem:[%s1219_s8 + $0x78] sm:$0xff] %v570_v22 }
 0x346   : > { %879 = shalt.err (!%p876_p7)
}
 0x347   : > { %s880_s9 = scalar_lea.hbm %s1250_s29, 2048  ;;  %s884_s6 = scalar_lea.hbm %s1304_s4, 4096 }
 0x348   : > { %p881_p9 = scmp.ne.s32.totalorder %s1250_s29, %s880_s9  ;;  %p885_p5 = scmp.lt.u32.totalorder %s1250_s29, %s1304_s4 }
 0x349   : > { %p886_p11 = scmp.lt.u32.totalorder %s884_s6, %s880_s9  ;;  %p888_p4 = scmp.lt.u32.totalorder %s880_s9, %s1250_s29 }
 0x34a   : > { %p882_p1 = pnand %p881_p9, %p1067_p12 }
 0x34b   : > { %p887_p2 = por %p886_p11, %p885_p5 }
 0x34c   : > { %p883_p0 = pneg %p882_p1 }
 0x34d   : > { %p889_p6 = por %p888_p4, %p887_p2 }
 0x34f   : > { %p890_p8 = pnand %p889_p6, %p883_p0 }
 0x351   : > { %893 = shalt.err (!%p890_p8)
}
 0x352   : > { %s946_s8 = smov 256   ;;  %s947_s25 = smov 16  }
 0x353   : > { %746 = dma.vmem_to_hbm [thread:$0]  (%p1067_p12), %s1252_s14, 2048, %s1250_s29, %s588_s19, %s946_s8, %s946_s8, %s947_s25  }
 0x354 PF: > { %s617_s20 = sand.u32 1, %s924_s15   ;;  %p1319_p10 = scmp.ne.s32.totalorder %s1309_s22, 0 }
 0x355   : > { %p1320_p13 = scmp.ge.s32.totalorder %s936_s18, 2  ;;  %s618_s5 = scalar_lea.sflag [#allocation4], %s617_s20 }
 0x357   : > { %p757_p3 = pnand %p1320_p13, %p1319_p10 }
 0x359   : > { %919 = dma.done.wait (!%p757_p3), %s618_s5, 2048  }
 0x35a   : > { %921 = vsyncadd (!%p757_p3), %s618_s5, 4294965248  ;;  %p18_p7 = scmp.ge.s32.totalorder %s1029_s27, 4   ;;  %s1321_s15 = smov %s928_s16 }
 0x35b   : > { %s1322_s16 = smov %s932_s17  ;;  %s1323_s17 = smov %s1063_s24 }
 0x35c   : > { %s1324_s18 = smov %s1029_s27  ;;  %20 = sbr.rel (!%p18_p7) target bundleno = 6 (0x6), region = 85 }
 0x363   :  { %623 = vsyncpa [#allocation3], 1 }
 0x364   :  { %625 = vsyncpa [#allocation3 + $0x1], 1 }
 0x365   :  { %626 = vsyncpa [#allocation6], 1 }
 0x366   :  { %627 = vsyncpa [#allocation4], 1 }
 0x367   :  { %629 = vsyncpa [#allocation4 + $0x1], 1 }

</bundles_post_ra>
